<compile_context>
chip_gen: v7x
topology: tpu7x:2x2x1
jax: 0.10.0
libtpu: 0.0.40
codegen_flags: <defaults>
</compile_context>

<pallas_src>
import functools

import jax
import jax.numpy as jnp
from jax import lax
from jax.experimental import pallas as pl
from jax.experimental.pallas import tpu as pltpu


def _vmem_limit_bytes():
    """Generation-aware scoped-VMEM budget: ~78% of physical VMEM
    (~100 MiB on v5e/v6e's 128 MiB, ~50 MiB on v7x's 64 MiB)."""
    cap = 64 * 1024 * 1024
    try:
        cap = int(getattr(pltpu.get_tpu_info(), "vmem_capacity_bytes", cap))
    except Exception:
        pass
    return (cap * 25) // 32


# ---------------------------------------------------------------------------
# Single fused kernel: predictor (both views) + mec (both pairs) + loss.
# ---------------------------------------------------------------------------
def mec_fused_kernel(z_ref, p_ref, w1_ref, gamma_ref, beta_ref, w2_ref, b2_ref,
                     o_ref, *, batch, n, lamda_inv):
    B = batch
    inv_lamda = 1.0 / lamda_inv  # compile-time constant

    # ---------------- predictor on BOTH views stacked: [2B, E] ----------------
    x = z_ref[...].astype(jnp.bfloat16)                                  # [2B, E]
    # Linear(E -> H), no bias.  w1_ref is pre-transposed [E, H], bf16.
    h = jnp.dot(x, w1_ref[...], preferred_element_type=jnp.float32)     # [2B, H] f32

    # BatchNorm1d (training mode, per-view biased batch stats).  Two-pass
    # variance for parity with PyTorch; rsqrt (EUP) instead of sqrt+divide.
    # Reshape [2B,H] -> [2,B,H] is sublane-aligned (B % 8 == 0) -> cheap.
    hv = h.reshape(2, B, h.shape[-1])
    inv_b = 1.0 / B
    mean = jnp.sum(hv, axis=1, keepdims=True) * inv_b                   # [2,1,H]
    centered = hv - mean
    var = jnp.sum(centered * centered, axis=1, keepdims=True) * inv_b
    hn = centered * lax.rsqrt(var + 1e-5)
    hn = hn * gamma_ref[...] + beta_ref[...]                            # bcast [1,H]
    hn = jnp.maximum(hn, 0.0).reshape(2 * B, h.shape[-1])               # ReLU

    # Linear(H -> E) with bias.  w2_ref is pre-transposed [H, E], bf16.
    zp = (jnp.dot(hn.astype(jnp.bfloat16), w2_ref[...],
                  preferred_element_type=jnp.float32)
          + b2_ref[...])                                                # [2B, E] f32
    # zp[:B] = predictor(z1), zp[B:] = predictor(z2).

    # -------------------------------- mec ------------------------------------
    def l2_normalize(v):
        # F.normalize: x / max(||x||, 1e-12) == x * rsqrt(max(||x||^2, 1e-24))
        sq = jnp.sum(v * v, axis=-1, keepdims=True)
        return v * lax.rsqrt(jnp.maximum(sq, 1e-24))

    p_n = l2_normalize(p_ref[...])                                      # [2B, E]
    z_n = l2_normalize(zp)                                              # [2B, E]

    def coef(k):  # sign and 1/k folded into a compile-time Python constant
        return (1.0 / k) if (k + 1) % 2 == 0 else (-1.0 / k)

    row = lax.broadcasted_iota(jnp.int32, (B, B), 0)
    col = lax.broadcasted_iota(jnp.int32, (B, B), 1)
    diag = (row == col).astype(jnp.float32)

    trace_sum = jnp.float32(0.0)
    # pair 0: mec(p1, predictor(z2)) ; pair 1: mec(p2, predictor(z1)).
    for pair in range(2):
        # Fold 1/lamda_inv into the smaller [B,E] operand (applied after the
        # normalization, matching c = (v1n @ v2n^T) / lamda_inv).
        v1 = (p_n[pair * B:(pair + 1) * B] * inv_lamda).astype(jnp.bfloat16)
        v2 = z_n[(1 - pair) * B:(2 - pair) * B].astype(jnp.bfloat16)
        # c = v1 @ v2^T: contract last dims (no explicit transpose of v2).
        c = lax.dot_general(v1, v2, (((1,), (1,)), ((), ())),
                            preferred_element_type=jnp.float32)         # [B,B] f32
        c_bf = c.astype(jnp.bfloat16)

        # Accumulate ONLY the trace of the truncated log(I + c) series; the
        # full sum_p matrix is never kept live.
        trace = coef(1) * jnp.sum(c * diag)
        power = c
        for k in range(2, n):  # k = 2 .. n-1: bf16 MXU matmuls, f32 accumulation
            power = lax.dot_general(power.astype(jnp.bfloat16), c_bf,
                                    (((1,), (0,)), ((), ())),
                                    preferred_element_type=jnp.float32)
            trace = trace + coef(k) * jnp.sum(power * diag)
        if n >= 2:
            # Last term: trace(c^n) = sum(c^(n-1) * c^T) — elementwise on the
            # VPU, dropping one full BxBxB MXU matmul.
            trace = trace + coef(n) * jnp.sum(power * c.T)
        trace_sum = trace_sum + trace

    # Final loss (batch_size stands in for metas[0][0].shape[0]); the divide
    # by lamda_inv (inside c) then multiply matches the PyTorch reference.
    loss = trace_sum * 0.5 * (1.0 / B)
    loss = -1.0 * loss * lamda_inv

    # Lane-dense output tile: broadcast the scalar over the whole (8, 128)
    # block so the store is unmasked; the host reads element [0, 0].
    o_ref[...] = jnp.full(o_ref.shape, loss, dtype=o_ref.dtype)


def _cost_estimate(B, E, H, n):
    mm_pred = 2 * (2 * B) * E * H * 2                 # both predictor matmuls
    mm_c = 2 * (2 * B * B * E)                        # two c-formations
    mm_pow = 2 * (2 * max(n - 2, 0) * B ** 3)         # Taylor-series matmuls
    return pl.CostEstimate(
        flops=mm_pred + mm_c + mm_pow,
        transcendentals=2 * H + 4 * B,                # BN + row-norm rsqrt
        bytes_accessed=(2 * 2 * B * E * 4             # z/p activations (f32)
                        + 2 * E * H * 2               # bf16 weights
                        + (2 * H + E) * 4             # gamma/beta/b2
                        + 8 * 128 * 4),               # output tile
    )


# ---------------------------------------------------------------------------
# Host-side wrapper (glue in plain JAX; hot path is the single fused kernel)
# ---------------------------------------------------------------------------
def mec_forward(params, z1, z2, p1, p2, *, n, lamda_inv=1.0):
    """z1,z2: encoder outputs; p1,p2: teacher outputs (already detached)."""
    # TODO(synk): external `encoders` / `teachers` modules are arbitrary
    # nn.Modules and are not translatable; their outputs are kernel inputs.
    B, E = z1.shape
    assert B % 8 == 0, "batch must be sublane-aligned (multiple of 8)"
    H = params["w1_t"].shape[1]

    z_both = jnp.concatenate([z1, z2], axis=0)        # [2B, E]
    p_both = jnp.concatenate([p1, p2], axis=0)        # [2B, E]
    # bf16 weights prepared once outside the kernel -> half the weight DMA.
    w1_bf = params["w1_t"].astype(jnp.bfloat16)
    w2_bf = params["w2_t"].astype(jnp.bfloat16)

    kernel = functools.partial(mec_fused_kernel, batch=B, n=int(n),
                               lamda_inv=float(lamda_inv))
    vmem_spec = pl.BlockSpec(memory_space=pltpu.MemorySpace.VMEM)
    out = pl.pallas_call(
        kernel,
        out_shape=jax.ShapeDtypeStruct((8, 128), jnp.float32),
        in_specs=[vmem_spec] * 7,          # whole arrays resident in VMEM, no
        out_specs=vmem_spec,               # grid -> no double-buffering at all
        compiler_params=pltpu.CompilerParams(
            vmem_limit_bytes=_vmem_limit_bytes()),
        cost_estimate=_cost_estimate(B, E, H, int(n)),
    )(z_both, p_both, w1_bf, params["gamma"], params["beta"], w2_bf,
      params["b2"])
    return out[0, 0]


def init_mec_params(key, embed_dim, hidden_size):
    k1, k2, k3 = jax.random.split(key, 3)
    # nn.Linear default init ~ U(-1/sqrt(fan_in), 1/sqrt(fan_in)); deterministic.
    w1 = jax.random.uniform(
        k1, (hidden_size, embed_dim), jnp.float32,
        -1.0 / embed_dim ** 0.5, 1.0 / embed_dim ** 0.5)
    gamma = jnp.ones((1, hidden_size), jnp.float32)   # BatchNorm1d weight
    beta = jnp.zeros((1, hidden_size), jnp.float32)   # BatchNorm1d bias
    w2 = jax.random.uniform(
        k2, (embed_dim, hidden_size), jnp.float32,
        -1.0 / hidden_size ** 0.5, 1.0 / hidden_size ** 0.5)
    b2 = jax.random.uniform(
        k3, (1, embed_dim), jnp.float32,
        -1.0 / hidden_size ** 0.5, 1.0 / hidden_size ** 0.5)
    # TODO(synk): BatchNorm1d running mean/var are never updated (loss-only parity).
    return dict(w1_t=w1.T, gamma=gamma, beta=beta, w2_t=w2.T, b2=b2)


if __name__ == "__main__":
    BATCH = 8          # sublane-aligned
    EMBED_DIM = 128    # lane-aligned
    HIDDEN = 256       # lane-aligned
    N_TERMS = 4

    key = jax.random.PRNGKey(0)
    kp, kz1, kz2, kp1, kp2 = jax.random.split(key, 5)
    params = init_mec_params(kp, EMBED_DIM, HIDDEN)

    z1 = jax.random.normal(kz1, (BATCH, EMBED_DIM), jnp.float32)
    z2 = jax.random.normal(kz2, (BATCH, EMBED_DIM), jnp.float32)
    p1 = jax.random.normal(kp1, (BATCH, EMBED_DIM), jnp.float32)
    p2 = jax.random.normal(kp2, (BATCH, EMBED_DIM), jnp.float32)

    loss_fn = jax.jit(functools.partial(mec_forward, n=N_TERMS, lamda_inv=1.0))
    loss = loss_fn(params, z1, z2, p1, p2)
    jax.block_until_ready(loss)
    print("KERNEL_OK")
</pallas_src>

<mosaic_0001>
module attributes {stable_mosaic.version = 11 : i64} {
  func.func @mec_fused_kernel(%arg0: memref<16x128xf32, #tpu.memory_space<vmem>>, %arg1: memref<16x128xf32, #tpu.memory_space<vmem>>, %arg2: memref<128x256xbf16, #tpu.memory_space<vmem>>, %arg3: memref<1x256xf32, #tpu.memory_space<vmem>>, %arg4: memref<1x256xf32, #tpu.memory_space<vmem>>, %arg5: memref<256x128xbf16, #tpu.memory_space<vmem>>, %arg6: memref<1x128xf32, #tpu.memory_space<vmem>>, %arg7: memref<8x128xf32, #tpu.memory_space<vmem>>) attributes {dimension_semantics = [], scalar_prefetch = 0 : i64, scratch_operands = 0 : i64, tpu.core_type = #tpu.core_type<tc>} {
    %c0 = arith.constant 0 : index
    %c0_0 = arith.constant 0 : index
    %0 = vector.load %arg0[%c0, %c0_0] : memref<16x128xf32, #tpu.memory_space<vmem>>, vector<16x128xf32>
    %1 = arith.truncf %0 : vector<16x128xf32> to vector<16x128xbf16>
    %c0_1 = arith.constant 0 : index
    %c0_2 = arith.constant 0 : index
    %2 = vector.load %arg2[%c0_1, %c0_2] : memref<128x256xbf16, #tpu.memory_space<vmem>>, vector<128x256xbf16>
    %cst = arith.constant dense<0.000000e+00> : vector<16x256xf32>
    %3 = tpu.matmul %1, %2, %cst {dimension_numbers = #tpu.dot_dimension_numbers<[1], [0], [0], [1], [0, 0, 1, 1], [], []>} : vector<16x128xbf16>, vector<128x256xbf16>, vector<16x256xf32> -> vector<16x256xf32>
    %4 = vector.shape_cast %3 : vector<16x256xf32> to vector<2x8x256xf32>
    %cst_3 = arith.constant dense<0.000000e+00> : vector<2x256xf32>
    %5 = vector.multi_reduction <add>, %4, %cst_3 [1] : vector<2x8x256xf32> to vector<2x256xf32>
    %6 = vector.shape_cast %5 : vector<2x256xf32> to vector<2x1x256xf32>
    %cst_4 = arith.constant 1.250000e-01 : f32
    %7 = vector.broadcast %cst_4 : f32 to vector<2x1x256xf32>
    %8 = arith.mulf %6, %7 : vector<2x1x256xf32>
    %9 = vector.broadcast %8 : vector<2x1x256xf32> to vector<2x8x256xf32>
    %10 = arith.subf %4, %9 : vector<2x8x256xf32>
    %11 = arith.mulf %10, %10 : vector<2x8x256xf32>
    %cst_5 = arith.constant dense<0.000000e+00> : vector<2x256xf32>
    %12 = vector.multi_reduction <add>, %11, %cst_5 [1] : vector<2x8x256xf32> to vector<2x256xf32>
    %13 = vector.shape_cast %12 : vector<2x256xf32> to vector<2x1x256xf32>
    %cst_6 = arith.constant 1.250000e-01 : f32
    %14 = vector.broadcast %cst_6 : f32 to vector<2x1x256xf32>
    %15 = arith.mulf %13, %14 : vector<2x1x256xf32>
    %cst_7 = arith.constant 9.99999974E-6 : f32
    %16 = vector.broadcast %cst_7 : f32 to vector<2x1x256xf32>
    %17 = arith.addf %15, %16 : vector<2x1x256xf32>
    %18 = math.rsqrt %17 : vector<2x1x256xf32>
    %19 = vector.broadcast %18 : vector<2x1x256xf32> to vector<2x8x256xf32>
    %20 = arith.mulf %10, %19 : vector<2x8x256xf32>
    %c0_8 = arith.constant 0 : index
    %c0_9 = arith.constant 0 : index
    %21 = vector.load %arg3[%c0_8, %c0_9] : memref<1x256xf32, #tpu.memory_space<vmem>>, vector<1x256xf32>
    %22 = vector.shape_cast %21 : vector<1x256xf32> to vector<1x1x256xf32>
    %23 = vector.broadcast %22 : vector<1x1x256xf32> to vector<2x8x256xf32>
    %24 = arith.mulf %20, %23 : vector<2x8x256xf32>
    %c0_10 = arith.constant 0 : index
    %c0_11 = arith.constant 0 : index
    %25 = vector.load %arg4[%c0_10, %c0_11] : memref<1x256xf32, #tpu.memory_space<vmem>>, vector<1x256xf32>
    %26 = vector.shape_cast %25 : vector<1x256xf32> to vector<1x1x256xf32>
    %27 = vector.broadcast %26 : vector<1x1x256xf32> to vector<2x8x256xf32>
    %28 = arith.addf %24, %27 : vector<2x8x256xf32>
    %cst_12 = arith.constant 0.000000e+00 : f32
    %29 = vector.broadcast %cst_12 : f32 to vector<2x8x256xf32>
    %30 = arith.maximumf %28, %29 : vector<2x8x256xf32>
    %31 = vector.shape_cast %30 : vector<2x8x256xf32> to vector<16x256xf32>
    %32 = arith.truncf %31 : vector<16x256xf32> to vector<16x256xbf16>
    %c0_13 = arith.constant 0 : index
    %c0_14 = arith.constant 0 : index
    %33 = vector.load %arg5[%c0_13, %c0_14] : memref<256x128xbf16, #tpu.memory_space<vmem>>, vector<256x128xbf16>
    %cst_15 = arith.constant dense<0.000000e+00> : vector<16x128xf32>
    %34 = tpu.matmul %32, %33, %cst_15 {dimension_numbers = #tpu.dot_dimension_numbers<[1], [0], [0], [1], [0, 0, 1, 1], [], []>} : vector<16x256xbf16>, vector<256x128xbf16>, vector<16x128xf32> -> vector<16x128xf32>
    %c0_16 = arith.constant 0 : index
    %c0_17 = arith.constant 0 : index
    %35 = vector.load %arg6[%c0_16, %c0_17] : memref<1x128xf32, #tpu.memory_space<vmem>>, vector<1x128xf32>
    %36 = vector.broadcast %35 : vector<1x128xf32> to vector<16x128xf32>
    %37 = arith.addf %34, %36 : vector<16x128xf32>
    %c0_18 = arith.constant 0 : index
    %c0_19 = arith.constant 0 : index
    %38 = vector.load %arg1[%c0_18, %c0_19] : memref<16x128xf32, #tpu.memory_space<vmem>>, vector<16x128xf32>
    %39 = arith.mulf %38, %38 : vector<16x128xf32>
    %cst_20 = arith.constant dense<0.000000e+00> : vector<16xf32>
    %40 = vector.multi_reduction <add>, %39, %cst_20 [1] : vector<16x128xf32> to vector<16xf32>
    %41 = vector.shape_cast %40 : vector<16xf32> to vector<16x1xf32>
    %cst_21 = arith.constant 1.000000e-24 : f32
    %42 = vector.broadcast %cst_21 : f32 to vector<16x1xf32>
    %43 = arith.maximumf %41, %42 : vector<16x1xf32>
    %44 = math.rsqrt %43 : vector<16x1xf32>
    %45 = vector.broadcast %44 : vector<16x1xf32> to vector<16x128xf32>
    %46 = arith.mulf %38, %45 : vector<16x128xf32>
    %47 = arith.mulf %37, %37 : vector<16x128xf32>
    %cst_22 = arith.constant dense<0.000000e+00> : vector<16xf32>
    %48 = vector.multi_reduction <add>, %47, %cst_22 [1] : vector<16x128xf32> to vector<16xf32>
    %49 = vector.shape_cast %48 : vector<16xf32> to vector<16x1xf32>
    %cst_23 = arith.constant 1.000000e-24 : f32
    %50 = vector.broadcast %cst_23 : f32 to vector<16x1xf32>
    %51 = arith.maximumf %49, %50 : vector<16x1xf32>
    %52 = math.rsqrt %51 : vector<16x1xf32>
    %53 = vector.broadcast %52 : vector<16x1xf32> to vector<16x128xf32>
    %54 = arith.mulf %37, %53 : vector<16x128xf32>
    %55 = tpu.iota {dimensions = array<i32: 0>} : vector<8x8xi32>
    %56 = tpu.iota {dimensions = array<i32: 1>} : vector<8x8xi32>
    %57 = arith.cmpi eq, %55, %56 : vector<8x8xi32>
    %58 = arith.extui %57 : vector<8x8xi1> to vector<8x8xi32>
    %59 = arith.sitofp %58 : vector<8x8xi32> to vector<8x8xf32>
    %60 = vector.extract_strided_slice %46 {offsets = [0, 0], sizes = [8, 128], strides = [1, 1]} : vector<16x128xf32> to vector<8x128xf32>
    %cst_24 = arith.constant 1.000000e+00 : f32
    %61 = vector.broadcast %cst_24 : f32 to vector<8x128xf32>
    %62 = arith.mulf %60, %61 : vector<8x128xf32>
    %63 = arith.truncf %62 : vector<8x128xf32> to vector<8x128xbf16>
    %64 = vector.extract_strided_slice %54 {offsets = [8, 0], sizes = [8, 128], strides = [1, 1]} : vector<16x128xf32> to vector<8x128xf32>
    %65 = arith.truncf %64 : vector<8x128xf32> to vector<8x128xbf16>
    %cst_25 = arith.constant dense<0.000000e+00> : vector<8x8xf32>
    %66 = tpu.matmul %63, %65, %cst_25 {dimension_numbers = #tpu.dot_dimension_numbers<[1], [1], [0], [0], [0, 0, 1, 0], [], []>} : vector<8x128xbf16>, vector<8x128xbf16>, vector<8x8xf32> -> vector<8x8xf32>
    %67 = arith.truncf %66 : vector<8x8xf32> to vector<8x8xbf16>
    %68 = arith.mulf %66, %59 : vector<8x8xf32>
    %69 = vector.shape_cast %68 : vector<8x8xf32> to vector<1x8x8xf32>
    %cst_26 = arith.constant dense<0.000000e+00> : vector<1xf32>
    %70 = vector.multi_reduction <add>, %69, %cst_26 [1, 2] : vector<1x8x8xf32> to vector<1xf32>
    %71 = vector.shape_cast %70 : vector<1xf32> to vector<1x1x1xf32>
    %72 = vector.extract %71[0, 0, 0] : f32 from vector<1x1x1xf32>
    %cst_27 = arith.constant 1.000000e+00 : f32
    %73 = arith.mulf %cst_27, %72 : f32
    %74 = arith.truncf %66 : vector<8x8xf32> to vector<8x8xbf16>
    %cst_28 = arith.constant dense<0.000000e+00> : vector<8x8xf32>
    %75 = tpu.matmul %74, %67, %cst_28 {dimension_numbers = #tpu.dot_dimension_numbers<[1], [0], [0], [1], [0, 0, 1, 1], [], []>} : vector<8x8xbf16>, vector<8x8xbf16>, vector<8x8xf32> -> vector<8x8xf32>
    %76 = arith.mulf %75, %59 : vector<8x8xf32>
    %77 = vector.shape_cast %76 : vector<8x8xf32> to vector<1x8x8xf32>
    %cst_29 = arith.constant dense<0.000000e+00> : vector<1xf32>
    %78 = vector.multi_reduction <add>, %77, %cst_29 [1, 2] : vector<1x8x8xf32> to vector<1xf32>
    %79 = vector.shape_cast %78 : vector<1xf32> to vector<1x1x1xf32>
    %80 = vector.extract %79[0, 0, 0] : f32 from vector<1x1x1xf32>
    %cst_30 = arith.constant -5.000000e-01 : f32
    %81 = arith.mulf %cst_30, %80 : f32
    %82 = arith.addf %73, %81 : f32
    %83 = arith.truncf %75 : vector<8x8xf32> to vector<8x8xbf16>
    %cst_31 = arith.constant dense<0.000000e+00> : vector<8x8xf32>
    %84 = tpu.matmul %83, %67, %cst_31 {dimension_numbers = #tpu.dot_dimension_numbers<[1], [0], [0], [1], [0, 0, 1, 1], [], []>} : vector<8x8xbf16>, vector<8x8xbf16>, vector<8x8xf32> -> vector<8x8xf32>
    %85 = arith.mulf %84, %59 : vector<8x8xf32>
    %86 = vector.shape_cast %85 : vector<8x8xf32> to vector<1x8x8xf32>
    %cst_32 = arith.constant dense<0.000000e+00> : vector<1xf32>
    %87 = vector.multi_reduction <add>, %86, %cst_32 [1, 2] : vector<1x8x8xf32> to vector<1xf32>
    %88 = vector.shape_cast %87 : vector<1xf32> to vector<1x1x1xf32>
    %89 = vector.extract %88[0, 0, 0] : f32 from vector<1x1x1xf32>
    %cst_33 = arith.constant 0.333333343 : f32
    %90 = arith.mulf %cst_33, %89 : f32
    %91 = arith.addf %82, %90 : f32
    %92 = tpu.transpose %66, [1, 0] : vector<8x8xf32> -> vector<8x8xf32>
    %93 = arith.mulf %84, %92 : vector<8x8xf32>
    %94 = vector.shape_cast %93 : vector<8x8xf32> to vector<1x8x8xf32>
    %cst_34 = arith.constant dense<0.000000e+00> : vector<1xf32>
    %95 = vector.multi_reduction <add>, %94, %cst_34 [1, 2] : vector<1x8x8xf32> to vector<1xf32>
    %96 = vector.shape_cast %95 : vector<1xf32> to vector<1x1x1xf32>
    %97 = vector.extract %96[0, 0, 0] : f32 from vector<1x1x1xf32>
    %cst_35 = arith.constant -2.500000e-01 : f32
    %98 = arith.mulf %cst_35, %97 : f32
    %99 = arith.addf %91, %98 : f32
    %cst_36 = arith.constant 0.000000e+00 : f32
    %100 = arith.addf %cst_36, %99 : f32
    %101 = vector.extract_strided_slice %46 {offsets = [8, 0], sizes = [8, 128], strides = [1, 1]} : vector<16x128xf32> to vector<8x128xf32>
    %cst_37 = arith.constant 1.000000e+00 : f32
    %102 = vector.broadcast %cst_37 : f32 to vector<8x128xf32>
    %103 = arith.mulf %101, %102 : vector<8x128xf32>
    %104 = arith.truncf %103 : vector<8x128xf32> to vector<8x128xbf16>
    %105 = vector.extract_strided_slice %54 {offsets = [0, 0], sizes = [8, 128], strides = [1, 1]} : vector<16x128xf32> to vector<8x128xf32>
    %106 = arith.truncf %105 : vector<8x128xf32> to vector<8x128xbf16>
    %cst_38 = arith.constant dense<0.000000e+00> : vector<8x8xf32>
    %107 = tpu.matmul %104, %106, %cst_38 {dimension_numbers = #tpu.dot_dimension_numbers<[1], [1], [0], [0], [0, 0, 1, 0], [], []>} : vector<8x128xbf16>, vector<8x128xbf16>, vector<8x8xf32> -> vector<8x8xf32>
    %108 = arith.truncf %107 : vector<8x8xf32> to vector<8x8xbf16>
    %109 = arith.mulf %107, %59 : vector<8x8xf32>
    %110 = vector.shape_cast %109 : vector<8x8xf32> to vector<1x8x8xf32>
    %cst_39 = arith.constant dense<0.000000e+00> : vector<1xf32>
    %111 = vector.multi_reduction <add>, %110, %cst_39 [1, 2] : vector<1x8x8xf32> to vector<1xf32>
    %112 = vector.shape_cast %111 : vector<1xf32> to vector<1x1x1xf32>
    %113 = vector.extract %112[0, 0, 0] : f32 from vector<1x1x1xf32>
    %cst_40 = arith.constant 1.000000e+00 : f32
    %114 = arith.mulf %cst_40, %113 : f32
    %115 = arith.truncf %107 : vector<8x8xf32> to vector<8x8xbf16>
    %cst_41 = arith.constant dense<0.000000e+00> : vector<8x8xf32>
    %116 = tpu.matmul %115, %108, %cst_41 {dimension_numbers = #tpu.dot_dimension_numbers<[1], [0], [0], [1], [0, 0, 1, 1], [], []>} : vector<8x8xbf16>, vector<8x8xbf16>, vector<8x8xf32> -> vector<8x8xf32>
    %117 = arith.mulf %116, %59 : vector<8x8xf32>
    %118 = vector.shape_cast %117 : vector<8x8xf32> to vector<1x8x8xf32>
    %cst_42 = arith.constant dense<0.000000e+00> : vector<1xf32>
    %119 = vector.multi_reduction <add>, %118, %cst_42 [1, 2] : vector<1x8x8xf32> to vector<1xf32>
    %120 = vector.shape_cast %119 : vector<1xf32> to vector<1x1x1xf32>
    %121 = vector.extract %120[0, 0, 0] : f32 from vector<1x1x1xf32>
    %cst_43 = arith.constant -5.000000e-01 : f32
    %122 = arith.mulf %cst_43, %121 : f32
    %123 = arith.addf %114, %122 : f32
    %124 = arith.truncf %116 : vector<8x8xf32> to vector<8x8xbf16>
    %cst_44 = arith.constant dense<0.000000e+00> : vector<8x8xf32>
    %125 = tpu.matmul %124, %108, %cst_44 {dimension_numbers = #tpu.dot_dimension_numbers<[1], [0], [0], [1], [0, 0, 1, 1], [], []>} : vector<8x8xbf16>, vector<8x8xbf16>, vector<8x8xf32> -> vector<8x8xf32>
    %126 = arith.mulf %125, %59 : vector<8x8xf32>
    %127 = vector.shape_cast %126 : vector<8x8xf32> to vector<1x8x8xf32>
    %cst_45 = arith.constant dense<0.000000e+00> : vector<1xf32>
    %128 = vector.multi_reduction <add>, %127, %cst_45 [1, 2] : vector<1x8x8xf32> to vector<1xf32>
    %129 = vector.shape_cast %128 : vector<1xf32> to vector<1x1x1xf32>
    %130 = vector.extract %129[0, 0, 0] : f32 from vector<1x1x1xf32>
    %cst_46 = arith.constant 0.333333343 : f32
    %131 = arith.mulf %cst_46, %130 : f32
    %132 = arith.addf %123, %131 : f32
    %133 = tpu.transpose %107, [1, 0] : vector<8x8xf32> -> vector<8x8xf32>
    %134 = arith.mulf %125, %133 : vector<8x8xf32>
    %135 = vector.shape_cast %134 : vector<8x8xf32> to vector<1x8x8xf32>
    %cst_47 = arith.constant dense<0.000000e+00> : vector<1xf32>
    %136 = vector.multi_reduction <add>, %135, %cst_47 [1, 2] : vector<1x8x8xf32> to vector<1xf32>
    %137 = vector.shape_cast %136 : vector<1xf32> to vector<1x1x1xf32>
    %138 = vector.extract %137[0, 0, 0] : f32 from vector<1x1x1xf32>
    %cst_48 = arith.constant -2.500000e-01 : f32
    %139 = arith.mulf %cst_48, %138 : f32
    %140 = arith.addf %132, %139 : f32
    %141 = arith.addf %100, %140 : f32
    %cst_49 = arith.constant 5.000000e-01 : f32
    %142 = arith.mulf %141, %cst_49 : f32
    %cst_50 = arith.constant 1.250000e-01 : f32
    %143 = arith.mulf %142, %cst_50 : f32
    %cst_51 = arith.constant -1.000000e+00 : f32
    %144 = arith.mulf %cst_51, %143 : f32
    %cst_52 = arith.constant 1.000000e+00 : f32
    %145 = arith.mulf %144, %cst_52 : f32
    %146 = vector.broadcast %145 : f32 to vector<8x128xf32>
    %c0_53 = arith.constant 0 : index
    %c0_54 = arith.constant 0 : index
    %147 = vector.load %arg7[%c0_53, %c0_54] : memref<8x128xf32, #tpu.memory_space<vmem>>, vector<8x128xf32>
    tpu.vector_store %arg7[%c0_53, %c0_54], %146 {strides = array<i32>} : memref<8x128xf32, #tpu.memory_space<vmem>>, vector<8x128xf32>,
    return
  }
}

</mosaic_0001>

<bundles_post_ra>
// kernel: mec_forward.1
= control target key start
LH: loop header
LB: loop body
LE: loop exit
PB: predicated region body
PF: predicated region fallthrough
CT: control target
= control target key end

     0   :  { %v1116_v1 = vmov 0   ;;  %vm1118_vm0 = vmmov 0   ;;  %vm550_vm1 = vcmask 1043456   ;;  %vm536_vm2 = vcmask 64512   ;;  %s1327_s2 = inlined_call_operand.vmem [shape: bf16[128,256], index: 2, kind: input, shape index: {}]   ;;  %s1328_s0 = inlined_call_operand.vmem [shape: f32[16,128], index: 0, kind: input, shape index: {}]   ;;  %s1329_s5 = inlined_call_operand.vmem [shape: bf16[256,128], index: 5, kind: input, shape index: {}]   ;;  %s1330_s3 = inlined_call_operand.vmem [shape: f32[1,256], index: 3, kind: input, shape index: {}]   ;;  %s1331_s4 = inlined_call_operand.vmem [shape: f32[1,256], index: 4, kind: input, shape index: {}]   ;;  %s1332_s6 = inlined_call_operand.vmem [shape: f32[1,128], index: 6, kind: input, shape index: {}]   ;;  %s1333_s1 = inlined_call_operand.vmem [shape: f32[16,128], index: 1, kind: input, shape index: {}]   ;;  %s1334_s7 = inlined_call_operand.vmem [shape: f32[8,128], index: 7, kind: output, shape index: {}]  }
   0x1   :  { %v1060_v0 = vld [vmem:[%s1327_s2 + $0x4] ss:$8 sps:$4 sm:$0xff]   ;;  %158 = vmatprep.mubr.bf16.mxu0 %v1116_v1  ;;  %v1062_v2 = vld [vmem:[%s1327_s2] ss:$8 sps:$4 sm:$0xff]   ;;  %v1063_v3 = vld [vmem:[%s1327_s2 + $0x14] ss:$8 sps:$4 sm:$0xff]  }
   0x2   :  { %126 = vmatprep.subr.bf16.mxu0 %v1060_v0  ;;  %v1065_v4 = vld [vmem:[%s1327_s2 + $0x10] ss:$8 sps:$4 sm:$0xff]   ;;  %v1066_v5 = vld [vmem:[%s1327_s2 + $0x24] ss:$8 sps:$4 sm:$0xff]   ;;  %v1068_v6 = vld [vmem:[%s1327_s2 + $0x20] ss:$8 sps:$4 sm:$0xff]  }
   0x3   :  { %127 = vmatpush1.bf16.msra.mxu0 %v1062_v2  ;;  %v1069_v7 = vld [vmem:[%s1327_s2 + $0x34] ss:$8 sps:$4 sm:$0xff]   ;;  %v1071_v8 = vld [vmem:[%s1327_s2 + $0x30] ss:$8 sps:$4 sm:$0xff]   ;;  %v1072_v9 = vld [vmem:[%s1327_s2 + $0x44] ss:$8 sps:$4 sm:$0xff]  }
   0x4   :  { %128 = vmatprep.subr.bf16.mxu0 %v1063_v3  ;;  %v1074_v10 = vld [vmem:[%s1327_s2 + $0x40] ss:$8 sps:$4 sm:$0xff]   ;;  %v1075_v11 = vld [vmem:[%s1327_s2 + $0x54] ss:$8 sps:$4 sm:$0xff]   ;;  %v1077_v12 = vld [vmem:[%s1327_s2 + $0x50] ss:$8 sps:$4 sm:$0xff]  }
   0x5   :  { %v1078_v13 = vld [vmem:[%s1327_s2 + $0x64] ss:$8 sps:$4 sm:$0xff]   ;;  %v1080_v14 = vld [vmem:[%s1327_s2 + $0x60] ss:$8 sps:$4 sm:$0xff]   ;;  %v1081_v15 = vld [vmem:[%s1327_s2 + $0x74] ss:$8 sps:$4 sm:$0xff]  }
   0x6   :  { %v1083_v16 = vld [vmem:[%s1327_s2 + $0x70] ss:$8 sps:$4 sm:$0xff]   ;;  %v27_v17 = vld [vmem:[%s1328_s0] sm:$0xff]  ;;  %v28_v18 = vld [vmem:[%s1328_s0 + $0x8] sm:$0xff] }
   0x7   :  { %129 = vmatpush1.bf16.msra.mxu0 %v1065_v4  ;;  %v29_v19 = vpack.c.bf16 %v28_v18, %v27_v17  ;;  %v1084_v20 = vld [vmem:[%s1329_s5 + $0x40] sm:$0xff]   ;;  %v1086_v22 = vld [vmem:[%s1329_s5 + $0x48] sm:$0xff]   ;;  %v1088_v24 = vld [vmem:[%s1329_s5 + $0x50] sm:$0xff]  }
   0x8   :  { %130 = vmatprep.subr.bf16.mxu0 %v1066_v5  ;;  %v1085_v21 = vld [vmem:[%s1329_s5] sm:$0xff]   ;;  %971 = vmatprep.subr.bf16.mxu1 %v1084_v20  ;;  %v1087_v23 = vld [vmem:[%s1329_s5 + $0x8] sm:$0xff]   ;;  %v1089_v25 = vld [vmem:[%s1329_s5 + $0x10] sm:$0xff]  }
   0x9   :  { %972 = vmatpush3.bf16.msra.mxu1 %v1085_v21  ;;  %v1090_v26 = vld [vmem:[%s1329_s5 + $0x58] sm:$0xff]   ;;  %v1092_v28 = vld [vmem:[%s1329_s5 + $0x60] sm:$0xff]   ;;  %v1094_v30 = vld [vmem:[%s1329_s5 + $0x68] sm:$0xff]  }
   0xa   :  { %973 = vmatprep.subr.bf16.mxu1 %v1086_v22  ;;  %v1091_v27 = vld [vmem:[%s1329_s5 + $0x18] sm:$0xff]   ;;  %v1093_v29 = vld [vmem:[%s1329_s5 + $0x20] sm:$0xff]   ;;  %v1095_v31 = vld [vmem:[%s1329_s5 + $0x28] sm:$0xff]  }
   0xb   :  { %131 = vmatpush1.bf16.msra.mxu0 %v1068_v6  ;;  %v1096_v32 = vld [vmem:[%s1329_s5 + $0x70] sm:$0xff]   ;;  %v1098_v34 = vld [vmem:[%s1329_s5 + $0x78] sm:$0xff]  }
   0xc   :  { %132 = vmatprep.subr.bf16.mxu0 %v1069_v7  ;;  %v1097_v33 = vld [vmem:[%s1329_s5 + $0x30] sm:$0xff]   ;;  %v1099_v35 = vld [vmem:[%s1329_s5 + $0x38] sm:$0xff]  }
   0xd   :  { %974 = vmatpush3.bf16.msra.mxu1 %v1087_v23 }
   0xe   :  { %975 = vmatprep.subr.bf16.mxu1 %v1088_v24 }
   0xf   :  { %133 = vmatpush1.bf16.msra.mxu0 %v1071_v8 }
  0x10   :  { %134 = vmatprep.subr.bf16.mxu0 %v1072_v9 }
  0x11   :  { %976 = vmatpush3.bf16.msra.mxu1 %v1089_v25 }
  0x12   :  { %977 = vmatprep.subr.bf16.mxu1 %v1090_v26 }
  0x13   :  { %135 = vmatpush1.bf16.msra.mxu0 %v1074_v10 }
  0x14   :  { %136 = vmatprep.subr.bf16.mxu0 %v1075_v11 }
  0x15   :  { %978 = vmatpush3.bf16.msra.mxu1 %v1091_v27 }
  0x16   :  { %979 = vmatprep.subr.bf16.mxu1 %v1092_v28 }
  0x17   :  { %137 = vmatpush1.bf16.msra.mxu0 %v1077_v12 }
  0x18   :  { %138 = vmatprep.subr.bf16.mxu0 %v1078_v13 }
  0x19   :  { %980 = vmatpush3.bf16.msra.mxu1 %v1093_v29 }
  0x1a   :  { %981 = vmatprep.subr.bf16.mxu1 %v1094_v30 }
  0x1b   :  { %139 = vmatpush1.bf16.msra.mxu0 %v1080_v14 }
  0x1c   :  { %140 = vmatprep.subr.bf16.mxu0 %v1081_v15 }
  0x1d   :  { %982 = vmatpush3.bf16.msra.mxu1 %v1095_v31 }
  0x1e   :  { %983 = vmatprep.subr.bf16.mxu1 %v1096_v32 }
  0x1f   :  { %141 = vmatpush1.bf16.msra.mxu0 %v1083_v16 }
  0x21   :  { %984 = vmatpush3.bf16.msra.mxu1 %v1097_v33 }
  0x22   :  { %159 = vmatmul.mubr.bf16.vlgmr.msra.gmra.mrb[0].mxu0 %v29_v19  ;;  %985 = vmatprep.subr.bf16.mxu1 %v1098_v34 }
  0x25   :  { %986 = vmatpush3.bf16.msra.mxu1 %v1099_v35 }
  0xf5   :  { %v160_v36 = vpop.f32.mrb[0].mxu0 }
  0xf6   :  { %v169_v37 = vrot.slane %v160_v36, 4  ;;  %v162_v38 = vpop.f32.mrb[1].mxu0 }
  0xf7   :  { %v175_v39 = vrot.slane %v162_v38, 4  ;;  %v164_v40 = vpop.f32.mrb[2].mxu0 }
  0xf8   :  { %v170_v41 = vadd.f32 %v169_v37, %v160_v36  ;;  %v181_v42 = vrot.slane %v164_v40, 4  ;;  %v166_v43 = vpop.f32.mrb[3].mxu0 }
  0xf9   :  { %v176_v44 = vadd.f32 %v175_v39, %v162_v38  ;;  %v187_v45 = vrot.slane %v166_v43, 4 }
  0xfa   :  { %v171_v46 = vrot.slane %v170_v41, 2  ;;  %v182_v47 = vadd.f32 %v181_v42, %v164_v40 }
  0xfb   :  { %v177_v48 = vrot.slane %v176_v44, 2  ;;  %v188_v49 = vadd.f32 %v187_v45, %v166_v43 }
  0xfc   :  { %v172_v50 = vadd.f32 %v171_v46, %v170_v41  ;;  %v183_v51 = vrot.slane %v182_v47, 2 }
  0xfd   :  { %v178_v52 = vadd.f32 %v177_v48, %v176_v44  ;;  %v189_v53 = vrot.slane %v188_v49, 2 }
  0xfe   :  { %v173_v54 = vrot.slane %v172_v50, 1  ;;  %v184_v55 = vadd.f32 %v183_v51, %v182_v47  ;;  %v245_v47 = vld [vmem:[%s1330_s3] sm:$0x3] }
  0xff   :  { %v179_v56 = vrot.slane %v178_v52, 1  ;;  %v190_v57 = vadd.f32 %v189_v53, %v188_v49  ;;  %v261_v49 = vld [vmem:[%s1331_s4] sm:$0x3] }
 0x100   :  { %v174_v58 = vadd.f32 %v173_v54, %v172_v50  ;;  %v185_v59 = vrot.slane %v184_v55, 1 }
 0x101   :  { %v180_v60 = vadd.f32 %v179_v56, %v178_v52  ;;  %v191_v61 = vrot.slane %v190_v57, 1 }
 0x102   :  { %v193_v62 = vmul.f32 0.125, %v174_v58  ;;  %v186_v63 = vadd.f32 %v185_v59, %v184_v55 }
 0x103   :  { %v194_v0 = vmul.f32 0.125, %v180_v60  ;;  %v192_v1 = vadd.f32 %v191_v61, %v190_v57 }
 0x104   :  { %v197_v2 = vsub.f32 %v160_v36, %v193_v62  ;;  %v195_v3 = vmul.f32 0.125, %v186_v63  ;;  %v247_v36 = vlaneseq }
 0x105   :  { %v198_v4 = vsub.f32 %v162_v38, %v194_v0  ;;  %v196_v5 = vmul.f32 0.125, %v192_v1 }
 0x106   :  { %v201_v6 = vmul.f32 %v197_v2, %v197_v2  ;;  %v199_v7 = vsub.f32 %v164_v40, %v195_v3  ;;  %v1262_v44 = vshrl.u32 %v247_v36, 7 }
 0x107   :  { %v202_v8 = vmul.f32 %v198_v4, %v198_v4  ;;  %v200_v9 = vsub.f32 %v166_v43, %v196_v5 }
 0x108   :  { %v205_v10 = vrot.slane %v201_v6, 4  ;;  %v203_v11 = vmul.f32 %v199_v7, %v199_v7  ;;  %v249_v46 = vsub.s32 0, %v1262_v44  ;;  %v253_v48 = vsub.s32 1, %v1262_v44 }
 0x109   :  { %v211_v12 = vrot.slane %v202_v8, 4  ;;  %v204_v13 = vmul.f32 %v200_v9, %v200_v9 }
 0x10a   :  { %v206_v14 = vadd.f32 %v205_v10, %v201_v6  ;;  %v217_v15 = vrot.slane %v203_v11, 4  ;;  %v250_v50 = vrot.slane %v245_v47, %v249_v46  ;;  %v254_v52 = vrot.slane %v245_v47, %v253_v48 }
 0x10b   :  { %v212_v16 = vadd.f32 %v211_v12, %v202_v8  ;;  %v223_v17 = vrot.slane %v204_v13, 4  ;;  %v266_v55 = vrot.slane %v261_v49, %v249_v46  ;;  %v270_v58 = vrot.slane %v261_v49, %v253_v48 }
 0x10c   :  { %v207_v18 = vrot.slane %v206_v14, 2  ;;  %v218_v19 = vadd.f32 %v217_v15, %v203_v11 }
 0x10d   :  { %v213_v20 = vrot.slane %v212_v16, 2  ;;  %v224_v21 = vadd.f32 %v223_v17, %v204_v13 }
 0x10e   :  { %v208_v22 = vadd.f32 %v207_v18, %v206_v14  ;;  %v219_v23 = vrot.slane %v218_v19, 2 }
 0x10f   :  { %v214_v24 = vadd.f32 %v213_v20, %v212_v16  ;;  %v225_v25 = vrot.slane %v224_v21, 2 }
 0x110   :  { %v209_v26 = vrot.slane %v208_v22, 1  ;;  %v220_v27 = vadd.f32 %v219_v23, %v218_v19 }
 0x111   :  { %v215_v28 = vrot.slane %v214_v24, 1  ;;  %v226_v29 = vadd.f32 %v225_v25, %v224_v21  ;;  %v1117_v25 = vmov 0.0  }
 0x112   :  { %v210_v30 = vadd.f32 %v209_v26, %v208_v22  ;;  %v221_v31 = vrot.slane %v220_v27, 1  ;;  %v459_v22 = vld [vmem:[%s1333_s1] sm:$0xff]  ;;  %1005 = vmatprep.subr.bf16.mxu0 %v1117_v25  ;;  %1011 = vmatprep.subr.bf16.mxu1 %v1117_v25  ;;  %v460_v26 = vld [vmem:[%s1333_s1 + $0x8] sm:$0xff] }
 0x113   :  { %v216_v32 = vadd.f32 %v215_v28, %v214_v24  ;;  %v227_v33 = vrot.slane %v226_v29, 1  ;;  %v461_v24 = vmul.f32 %v459_v22, %v459_v22  ;;  %1007 = vmatprep.mubr.msk.bf16.mxu0 %vm1118_vm0, %v1117_v25 }
 0x114   :  { %v229_v34 = vmul.f32 0.125, %v210_v30  ;;  %v222_v35 = vadd.f32 %v221_v31, %v220_v27  ;;  %v462_v27 = vmul.f32 %v460_v26, %v460_v26 }
 0x115   :  { %v230_v37 = vmul.f32 0.125, %v216_v32  ;;  %v228_v38 = vadd.f32 %v227_v33, %v226_v29 }
 0x116   :  { %v233_v39 = vadd.f32 1e-05, %v229_v34  ;;  %v231_v40 = vmul.f32 0.125, %v222_v35 }
 0x117   :  { %v234_v41 = vadd.f32 1e-05, %v230_v37  ;;  %v232_v42 = vmul.f32 0.125, %v228_v38 }
 0x118   :  { %1100 = vrsqrt.f32 %v233_v39  ;;  %v235_v43 = vadd.f32 1e-05, %v231_v40 }
 0x119   :  { %1102 = vrsqrt.f32 %v234_v41  ;;  %v236_v45 = vadd.f32 1e-05, %v232_v42 }
 0x11a   :  { %1104 = vrsqrt.f32 %v235_v43 }
 0x11b   :  { %1106 = vrsqrt.f32 %v236_v45 }
 0x122   :  { %v1101_v51 = vpop.eup %1100 }
 0x123   :  { %v1103_v53 = vpop.eup %1102  ;;  %v241_v54 = vmul.f32 %v1101_v51, %v197_v2 }
 0x124   :  { %v1105_v56 = vpop.eup %1104  ;;  %v242_v57 = vmul.f32 %v1103_v53, %v198_v4 }
 0x125   :  { %v1107_v59 = vpop.eup %1106  ;;  %v257_v60 = vmul.f32 %v250_v50, %v241_v54  ;;  %v243_v61 = vmul.f32 %v1105_v56, %v199_v7  ;;  %v949_v7 = vld [vmem:[%s1332_s6] ss:$0 sm:$0xff]  ;;  %v488_v56 = vand.u32 127, %v247_v36 }
 0x126   :  { %v244_v62 = vmul.f32 %v1107_v59, %v200_v9  ;;  %v258_v63 = vmul.f32 %v254_v52, %v242_v57 }
 0x127   :  { %v259_v0 = vmul.f32 %v250_v50, %v243_v61  ;;  %v273_v1 = vadd.f32 %v266_v55, %v257_v60  ;;  %vm489_vm3 = vcmp.eq.s32.totalorder %v1262_v44, %v488_v56 }
 0x128   :  { %v260_v3 = vmul.f32 %v254_v52, %v244_v62  ;;  %v274_v5 = vadd.f32 %v270_v58, %v258_v63  ;;  %v1302_v57 = vsel %vm489_vm3, 1.0, %v1117_v25 }
 0x129   :  { %v275_v6 = vadd.f32 %v266_v55, %v259_v0  ;;  %v277_v10 = vmax.f32 %v273_v1, 0.0 }
 0x12a   :  { %v276_v8 = vadd.f32 %v270_v58, %v260_v3  ;;  %v278_v12 = vmax.f32 %v274_v5, 0.0 }
 0x12b   :  { %v279_v11 = vmax.f32 %v275_v6, 0.0 }
 0x12c   :  { %v280_v13 = vmax.f32 %v276_v8, 0.0 }
 0x12d   :  { %v281_v2 = vpack.c.bf16 %v279_v11, %v277_v10 }
 0x12e   :  { %v282_v14 = vpack.c.bf16 %v280_v13, %v278_v12 }
 0x130   :  { %450 = vmatprep.mubr.bf16.mxu1 %v282_v14 }
 0x131   :  { %451 = vmatmul.mubr.bf16.vlgmr.msra.gmra.mrb[0].mxu1 %v281_v2 }
 0x132   :  { %1013 = vmatprep.mubr.msk.bf16.mxu1 %vm1118_vm0, %v1117_v25 }
 0x204   :  { %v987_v4 = vpop.f32.mrb[0].mxu1 }
 0x205   :  { %v988_v15 = vpop.f32.mrb[1].mxu1 }
 0x206   :  { %v989_v9 = vadd.f32 %v988_v15, %v987_v4  ;;  %v990_v16 = vpop.f32.mrb[2].mxu1 }
 0x207   :  { %v991_v17 = vpop.f32.mrb[3].mxu1 }
 0x208   :  { %v992_v18 = vadd.f32 %v991_v17, %v990_v16  ;;  %v453_v19 = vadd.f32 %v989_v9, %v949_v7 }
 0x20a   :  { %v473_v20 = vmul.f32 %v453_v19, %v453_v19  ;;  %v456_v21 = vadd.f32 %v992_v18, %v949_v7 }
 0x20c   :  { %475 = vadd.xlane.f32.xlu1 %v473_v20  ;;  %v474_v23 = vmul.f32 %v456_v21, %v456_v21 }
 0x20e   :  { %477 = vadd.xlane.f32.xlu0 %v474_v23 }
 0x210   :  { %465 = vadd.xlane.f32.xlu1 %v462_v27 }
 0x212   :  { %463 = vadd.xlane.f32.xlu0 %v461_v24 }
 0x299   :  { %v476_v39 = vpop.xlane.xlu1 %475 }
 0x29a   :  { %v479_v40 = vmax.f32 %v476_v39, 1e-24 }
 0x29b   :  { %v478_v28 = vpop.xlane.xlu0 %477 }
 0x29c   :  { %v480_v29 = vmax.f32 %v478_v28, 1e-24 }
 0x29d   :  { %v466_v41 = vpop.xlane.xlu1 %465 }
 0x29e   :  { %1108 = vrsqrt.f32 %v480_v29  ;;  %v468_v42 = vmax.f32 %v466_v41, 1e-24 }
 0x29f   :  { %v464_v30 = vpop.xlane.xlu0 %463 }
 0x2a0   :  { %v467_v31 = vmax.f32 %v464_v30, 1e-24 }
 0x2a2   :  { %1110 = vrsqrt.f32 %v467_v31 }
 0x2a3   :  { %1112 = vrsqrt.f32 %v479_v40 }
 0x2a4   :  { %1114 = vrsqrt.f32 %v468_v42 }
 0x2a8   :  { %v1109_v32 = vpop.eup %1108 }
 0x2a9   :  { %v484_v33 = vmul.f32 %v1109_v32, %v456_v21 }
 0x2ab   :  { %v493_v34 = vpack.c.bf16 %v484_v33, %v484_v33 }
 0x2ac   :  { %v1111_v35 = vpop.eup %1110 }
 0x2ad   :  { %1006 = vmatpush3.bf16.xpose.msra.mxu0 %v493_v34  ;;  %v471_v37 = vmul.f32 %v1111_v35, %v459_v22  ;;  %v1113_v50 = vpop.eup %1112 }
 0x2ae   :  { %1017 = vmatprep.subr.bf16.mxu0 %v1117_v25  ;;  %v483_v51 = vmul.f32 %v1113_v50, %v453_v19  ;;  %v1115_v52 = vpop.eup %1114 }
 0x2af   :  { %v492_v38 = vpack.c.bf16 %v471_v37, %v471_v37  ;;  %v472_v54 = vmul.f32 %v1115_v52, %v460_v26 }
 0x2b0   :  { %v710_v53 = vpack.c.bf16 %v483_v51, %v483_v51 }
 0x2b1   :  { %v709_v55 = vpack.c.bf16 %v472_v54, %v472_v54 }
 0x2b4   :  { %1008 = vmatmul.mubr.bf16.vlgmr.msra.gmra.mrb[4].mxu0 %v492_v38 }
 0x2b5   :  { %1019 = vmatprep.mubr.msk.bf16.mxu0 %vm1118_vm0, %v1117_v25 }
 0x387   :  { %v528_v43 = vpop.f32.mrb[4].mxu0 }
 0x388   :  { %v534_v45 = vpack.c.bf16 %v528_v43, %v528_v43  ;;  %663 = vxpose.xlu0.b32.start.end [1/1] (short) (narrow) %v528_v43, 8  ;;  %v1009_v46 = vpop.f32.mrb[5].mxu0  ;;  %v535_v58 = vmul.f32 %v1302_v57, %v528_v43 }
 0x389   :  { %v531_v47 = vpop.f32.mrb[6].mxu0 }
 0x38a   :  { %v1010_v48 = vpop.f32.mrb[7].mxu0  ;;  %v551_v49 = vsel %vm550_vm1, %v534_v45, 0  ;;  %v537_v59 = vsel %vm536_vm2, %v535_v58, 0.0 }
 0x38b   :  { %1012 = vmatpush3.bf16.msra.mxu1 %v551_v49  ;;  %1018 = vmatpush3.bf16.msra.mxu0 %v551_v49 }
 0x38c   :  { %1023 = vmatprep.subr.bf16.mxu1 %v1117_v25  ;;  %1029 = vmatprep.subr.bf16.mxu0 %v1117_v25 }
 0x38e   :  { %1014 = vmatmul.mubr.msk.bf16.vlgmr.msra.gmra.mrb[4].mxu1 %vm536_vm2, %v534_v45 }
 0x38f   :  { %1025 = vmatprep.mubr.msk.bf16.mxu1 %vm1118_vm0, %v1117_v25 }
 0x394   :  { %1024 = vmatpush3.bf16.xpose.msra.mxu1 %v710_v53 }
 0x395   :  { %1035 = vmatprep.subr.bf16.mxu1 %v1117_v25 }
 0x39b   :  { %1026 = vmatmul.mubr.bf16.vlgmr.msra.gmra.mrb[8].mxu1 %v709_v55 }
 0x39c   :  { %1037 = vmatprep.mubr.msk.bf16.mxu1 %vm1118_vm0, %v1117_v25 }
 0x3b5   :  { %538 = vadd.xlane.f32.xlu0 %v537_v59 }
 0x408   :  { %v679_v60 = vpop.trf.xlu0 }
 0x442   :  { %v539_v61 = vpop.xlane.xlu0 %538 }
 0x443   :  { %v540_v62 = vrot.slane %v539_v61, 4 }
 0x445   :  { %v541_v63 = vadd.f32 %v540_v62, %v539_v61 }
 0x447   :  { %v542_v0 = vrot.slane %v541_v63, 2 }
 0x449   :  { %v543_v1 = vadd.f32 %v542_v0, %v541_v63 }
 0x44b   :  { %v544_v3 = vrot.slane %v543_v1, 1 }
 0x44d   :  { %v545_v5 = vadd.f32 %v544_v3, %v543_v1 }
 0x44f   :  { %1041 = vpush %v545_v5 }
 0x461   :  { %v587_v36 = vpop.f32.mrb[4].mxu1 }
 0x462   :  { %v593_v44 = vmul.f32 %v1302_v57, %v587_v36  ;;  %v606_v6 = vpack.c.bf16 %v587_v36, %v587_v36  ;;  %v1015_v8 = vpop.f32.mrb[5].mxu1 }
 0x463   :  { %v590_v10 = vpop.f32.mrb[6].mxu1 }
 0x464   :  { %v1016_v11 = vpop.f32.mrb[7].mxu1  ;;  %1020 = vmatmul.mubr.msk.bf16.vlgmr.msra.gmra.mrb[8].mxu0 %vm536_vm2, %v606_v6  ;;  %v594_v12 = vsel %vm536_vm2, %v593_v44, 0.0 }
 0x465   :  { %595 = vadd.xlane.f32.xlu1 %v594_v12  ;;  %1031 = vmatprep.mubr.msk.bf16.mxu0 %vm1118_vm0, %v1117_v25 }
 0x46e   :  { %v745_v13 = vpop.f32.mrb[8].mxu1 }
 0x46f   :  { %v751_v2 = vpack.c.bf16 %v745_v13, %v745_v13  ;;  %v1027_v14 = vpop.f32.mrb[9].mxu1  ;;  %v752_v4 = vmul.f32 %v1302_v57, %v745_v13 }
 0x470   :  { %v748_v15 = vpop.f32.mrb[10].mxu1 }
 0x471   :  { %v1028_v7 = vpop.f32.mrb[11].mxu1  ;;  %v753_v9 = vsel %vm536_vm2, %v752_v4, 0.0  ;;  %v766_v16 = vsel %vm550_vm1, %v751_v2, 0 }
 0x472   :  { %754 = vadd.xlane.f32.xlu0 %v753_v9  ;;  %1030 = vmatpush3.bf16.msra.mxu0 %v766_v16 }
 0x473   :  { %1036 = vmatpush3.bf16.msra.mxu1 %v766_v16 }
 0x475   :  { %1032 = vmatmul.mubr.msk.bf16.vlgmr.msra.gmra.mrb[12].mxu0 %vm536_vm2, %v751_v2 }
 0x480   :  { %s1042_s1 = spop %1041 }
 0x498   :  { %878 = vxpose.xlu1.b32.start.end [1/1] (short) (narrow) %v745_v13, 8 }
 0x4f2   :  { %v596_v17 = vpop.xlane.xlu1 %595 }
 0x4f3   :  { %v597_v18 = vrot.slane %v596_v17, 4 }
 0x4f5   :  { %v598_v19 = vadd.f32 %v597_v18, %v596_v17 }
 0x4f7   :  { %v599_v20 = vrot.slane %v598_v19, 2 }
 0x4f9   :  { %v600_v21 = vadd.f32 %v599_v20, %v598_v19 }
 0x4fb   :  { %v601_v22 = vrot.slane %v600_v21, 1 }
 0x4fd   :  { %v602_v23 = vadd.f32 %v601_v22, %v600_v21 }
 0x4ff   :  { %1043 = vpush %v602_v23  ;;  %v755_v40 = vpop.xlane.xlu0 %754 }
 0x500   :  { %v756_v41 = vrot.slane %v755_v40, 4 }
 0x502   :  { %v757_v43 = vadd.f32 %v756_v41, %v755_v40 }
 0x504   :  { %v758_v47 = vrot.slane %v757_v43, 2 }
 0x506   :  { %v759_v54 = vadd.f32 %v758_v47, %v757_v43 }
 0x518   :  { %v894_v42 = vpop.trf.xlu1 }
 0x530   :  { %s1044_s25 = spop %1043 }
 0x531   :  { %s604_s29 = smul.f32 -0.5, %s1044_s25 }
 0x533   :  { %s605_s10 = sadd.f32 %s1042_s1, %s604_s29 }
 0x537   :  { %v644_v24 = vpop.f32.mrb[8].mxu0 }
 0x538   :  { %v650_v25 = vmul.f32 %v1302_v57, %v644_v24  ;;  %v695_v26 = vmul.f32 %v679_v60, %v644_v24  ;;  %v1021_v27 = vpop.f32.mrb[9].mxu0  ;;  %v760_v60 = vrot.slane %v759_v54, 1 }
 0x539   :  { %v647_v28 = vpop.f32.mrb[10].mxu0 }
 0x53a   :  { %v1022_v29 = vpop.f32.mrb[11].mxu0  ;;  %v696_v30 = vsel %vm536_vm2, %v695_v26, 0.0  ;;  %v651_v31 = vsel %vm536_vm2, %v650_v25, 0.0  ;;  %v761_v63 = vadd.f32 %v760_v60, %v759_v54 }
 0x53b   :  { %697 = vadd.xlane.f32.xlu1 %v696_v30  ;;  %652 = vadd.xlane.f32.xlu0 %v651_v31 }
 0x548   :  { %v802_v32 = vpop.f32.mrb[12].mxu0 }
 0x549   :  { %v808_v33 = vmul.f32 %v1302_v57, %v802_v32  ;;  %v821_v34 = vpack.c.bf16 %v802_v32, %v802_v32  ;;  %v1033_v35 = vpop.f32.mrb[13].mxu0 }
 0x54a   :  { %v805_v37 = vpop.f32.mrb[14].mxu0 }
 0x54b   :  { %v1034_v38 = vpop.f32.mrb[15].mxu0  ;;  %1038 = vmatmul.mubr.msk.bf16.vlgmr.msra.gmra.mrb[12].mxu1 %vm536_vm2, %v821_v34  ;;  %v809_v39 = vsel %vm536_vm2, %v808_v33, 0.0 }
 0x54c   :  { %810 = vadd.xlane.f32.xlu1 %v809_v39 }
 0x5c8   :  { %v653_v45 = vpop.xlane.xlu0 %652  ;;  %v698_v46 = vpop.xlane.xlu1 %697 }
 0x5c9   :  { %v654_v48 = vrot.slane %v653_v45, 4  ;;  %v699_v49 = vrot.slane %v698_v46, 4 }
 0x5cb   :  { %v655_v50 = vadd.f32 %v654_v48, %v653_v45  ;;  %v700_v51 = vadd.f32 %v699_v49, %v698_v46 }
 0x5cd   :  { %v656_v52 = vrot.slane %v655_v50, 2  ;;  %v701_v53 = vrot.slane %v700_v51, 2 }
 0x5cf   :  { %v657_v55 = vadd.f32 %v656_v52, %v655_v50  ;;  %v702_v56 = vadd.f32 %v701_v53, %v700_v51 }
 0x5d1   :  { %v658_v58 = vrot.slane %v657_v55, 1  ;;  %v703_v59 = vrot.slane %v702_v56, 1 }
 0x5d3   :  { %v659_v61 = vadd.f32 %v658_v58, %v657_v55  ;;  %v704_v62 = vadd.f32 %v703_v59, %v702_v56 }
 0x5d5   :  { %1045 = vpush %v659_v61 }
 0x5d6   :  { %1047 = vpush %v704_v62 }
 0x5d7   :  { %1049 = vpush %v761_v63 }
 0x5d9   :  { %v811_v0 = vpop.xlane.xlu1 %810 }
 0x5da   :  { %v812_v1 = vrot.slane %v811_v0, 4 }
 0x5dc   :  { %v813_v3 = vadd.f32 %v812_v1, %v811_v0 }
 0x5de   :  { %v814_v5 = vrot.slane %v813_v3, 2 }
 0x5e0   :  { %v815_v36 = vadd.f32 %v814_v5, %v813_v3 }
 0x5e2   :  { %v816_v44 = vrot.slane %v815_v36, 1 }
 0x5e4   :  { %v817_v6 = vadd.f32 %v816_v44, %v815_v36 }
 0x5e6   :  { %1051 = vpush %v817_v6 }
 0x606   :  { %s1046_s26 = spop %1045 }
 0x607   :  { %s1048_s27 = spop %1047  ;;  %s661_s8 = smul.f32 0.33333334, %s1046_s26 }
 0x608   :  { %s1050_s28 = spop %1049  ;;  %s706_s16 = smul.f32 -0.25, %s1048_s27 }
 0x609   :  { %s662_s11 = sadd.f32 %s661_s8, %s605_s10 }
 0x60b   :  { %s707_s18 = sadd.f32 %s706_s16, %s662_s11 }
 0x617   :  { %s1052_s30 = spop %1051 }
 0x618   :  { %s819_s9 = smul.f32 -0.5, %s1052_s30 }
 0x61a   :  { %s820_s12 = sadd.f32 %s1050_s28, %s819_s9 }
 0x61e   :  { %v859_v8 = vpop.f32.mrb[12].mxu1 }
 0x61f   :  { %v865_v10 = vmul.f32 %v1302_v57, %v859_v8  ;;  %v910_v11 = vmul.f32 %v894_v42, %v859_v8  ;;  %v1039_v12 = vpop.f32.mrb[13].mxu1 }
 0x620   :  { %v862_v13 = vpop.f32.mrb[14].mxu1 }
 0x621   :  { %v1040_v2 = vpop.f32.mrb[15].mxu1  ;;  %v866_v14 = vsel %vm536_vm2, %v865_v10, 0.0  ;;  %v911_v4 = vsel %vm536_vm2, %v910_v11, 0.0 }
 0x622   :  { %867 = vadd.xlane.f32.xlu0 %v866_v14  ;;  %912 = vadd.xlane.f32.xlu1 %v911_v4 }
 0x6af   :  { %v868_v15 = vpop.xlane.xlu0 %867  ;;  %v913_v7 = vpop.xlane.xlu1 %912 }
 0x6b0   :  { %v869_v9 = vrot.slane %v868_v15, 4  ;;  %v914_v16 = vrot.slane %v913_v7, 4 }
 0x6b2   :  { %v870_v17 = vadd.f32 %v869_v9, %v868_v15  ;;  %v915_v18 = vadd.f32 %v914_v16, %v913_v7 }
 0x6b4   :  { %v871_v19 = vrot.slane %v870_v17, 2  ;;  %v916_v20 = vrot.slane %v915_v18, 2 }
 0x6b6   :  { %v872_v21 = vadd.f32 %v871_v19, %v870_v17  ;;  %v917_v57 = vadd.f32 %v916_v20, %v915_v18 }
 0x6b8   :  { %v873_v22 = vrot.slane %v872_v21, 1  ;;  %v918_v23 = vrot.slane %v917_v57, 1 }
 0x6ba   :  { %v874_v24 = vadd.f32 %v873_v22, %v872_v21  ;;  %v919_v25 = vadd.f32 %v918_v23, %v917_v57 }
 0x6bc   :  { %1053 = vpush %v874_v24 }
 0x6bd   :  { %1055 = vpush %v919_v25 }
 0x6ed   :  { %s1054_s13 = spop %1053 }
 0x6ee   :  { %s876_s14 = smul.f32 0.33333334, %s1054_s13  ;;  %s1056_s15 = spop %1055 }
 0x6ef   :  { %s921_s2 = smul.f32 -0.25, %s1056_s15 }
 0x6f0   :  { %s877_s17 = sadd.f32 %s876_s14, %s820_s12 }
 0x6f2   :  { %s922_s19 = sadd.f32 %s921_s2, %s877_s17 }
 0x6f4   :  { %s923_s5 = sadd.f32 %s922_s19, %s707_s18 }
 0x6f6   :  { %s924_s0 = smul.f32 0.5, %s923_s5 }
 0x6f8   :  { %s925_s20 = smul.f32 0.125, %s924_s0 }
 0x6fa   :  { %s926_s21 = smul.f32 -1.0, %s925_s20 }
 0x6fc   :  { %v927_v26 = vstv %s926_s21 }
 0x6fd   :  { %928 = vst [vmem:[%s1334_s7] sm:$0xff] %v927_v26 }

</bundles_post_ra>
